<compile_context>
chip_gen: v6e
topology: v6e:2x2x1
jax: 0.10.0
libtpu: 0.0.40
codegen_flags: <defaults>
</compile_context>

<pallas_src>
import functools

import jax
import jax.numpy as jnp
from jax.experimental import pallas as pl
from jax.experimental.pallas import tpu as pltpu

EPSILON = 1e-8
_LANE = 128
_SUBLANE = 8


def _vdrop_conv_kernel(x_ref, wmu_ref, wvar_ref, bias_ref, noise_ref, o_ref,
                       acc_mu_ref, acc_var_ref, *, kh, oh, sh, tb):
    # x_ref:     (TB, Hp, Kpad)   padded input, NHWC-flattened, K zero-padded
    # wmu_ref:   (kh, Kpad, L)    banded mean weights     (VMEM resident)
    # wvar_ref:  (kh, Kpad, L)    banded exp(logvar)      (VMEM resident)
    # bias_ref:  (1, L)           f32
    # noise_ref: (TB, OH, L)      f32 standard normal
    # o_ref:     (TB, OH, L)      f32
    # acc_*_ref: (TB*OH, L)       f32 VMEM scratch accumulators
    m_rows = tb * oh
    x = x_ref[...]
    # Square hoisted out of the ki loop: each padded row squared once (not kh
    # times), squared in f32, cast back to the matmul input dtype.
    xf = x.astype(jnp.float32)
    x2 = (xf * xf).astype(x.dtype)

    for ki in range(kh):                              # tiny static loop (unrolled)
        hi = ki + sh * (oh - 1) + 1
        # TODO(synk): stride > 1 (sh > 1) path is not exercised by the self-test.
        xs = x[:, ki:hi:sh, :].reshape(m_rows, x.shape[-1])
        x2s = x2[:, ki:hi:sh, :].reshape(m_rows, x.shape[-1])
        m = jnp.dot(xs, wmu_ref[ki], preferred_element_type=jnp.float32)
        v = jnp.dot(x2s, wvar_ref[ki], preferred_element_type=jnp.float32)
        if ki == 0:
            acc_mu_ref[...] = m
            acc_var_ref[...] = v
        else:
            acc_mu_ref[...] += m
            acc_var_ref[...] += v

    y_sigma = jnp.sqrt(jnp.maximum(acc_var_ref[...], EPSILON))
    noise = noise_ref[...].reshape(m_rows, noise_ref.shape[-1])
    y = y_sigma * noise + acc_mu_ref[...] + bias_ref[...]
    o_ref[...] = y.reshape(o_ref.shape).astype(o_ref.dtype)


def _band_weights(w, kh, kw, c_in, c_out, wp_len, ow_len, sw):
    """(Cout, C, kh, kw) -> (kh, Wp*C, Cout*OW) banded ("Toeplitz") layout.

    band[ki, wp*C + c, co*OW + ow] = w[co, c, ki, wp - ow*sw]   (0 off-band)
    so that   xs @ band[ki]   is the ki-row term of the convolution, with
    xs[row, wp*C + c] = x_padded[c, oh*sh + ki, wp].
    """
    wp_idx = jnp.arange(wp_len)[:, None]              # (Wp, 1)
    ow_idx = jnp.arange(ow_len)[None, :]              # (1, OW)
    kj = wp_idx - ow_idx * sw                         # (Wp, OW)
    valid = (kj >= 0) & (kj < kw)
    kj_c = jnp.clip(kj, 0, kw - 1)
    wg = w[:, :, :, kj_c]                             # (Cout, C, kh, Wp, OW)
    wg = jnp.where(valid[None, None, None], wg, 0.0)
    wg = wg.transpose(2, 3, 1, 0, 4)                  # (kh, Wp, C, Cout, OW)
    return wg.reshape(kh, wp_len * c_in, c_out * ow_len)


def _pick_batch_tile(n, oh, hp, kpad, itemsize, target_m=256,
                     x_tile_budget=8 << 20):
    """Images per grid step: fill the MXU M dim (TB*OH) toward 256 while
    keeping >= 2 grid steps when n allows (pipelining / v7x 2 TCs) and
    bounding the x-tile VMEM footprint."""
    if oh % _SUBLANE != 0:
        # In-kernel (TB, OH) -> (TB*OH) merge is layout-free only if OH % 8 == 0.
        return 1
    tb = max(1, min(target_m // max(oh, 1), n))
    if n >= 2:
        tb = min(tb, max(1, n // 2))
    while tb > 1 and tb * hp * kpad * itemsize > x_tile_budget:
        tb //= 2
    return max(tb, 1)


def vdrop_conv2d_forward(x, weight, w_logvar, bias, noise_nchw,
                         stride=(1, 1), padding=(0, 0), use_bf16=True):
    """Training-mode VDropConv2d forward.

    x:          (N, Cin, H, W)      float32
    weight:     (Cout, Cin, kh, kw) float32   (w_mu)
    w_logvar:   (Cout, Cin, kh, kw) float32
    bias:       (Cout,) or None
    noise_nchw: (N, Cout, OH, OW)   float32   (standard normal)
    Returns:    (N, Cout, OH, OW)   float32
    """
    N, C, H, W = x.shape
    Cout, Cin, kh, kw = weight.shape
    assert Cin == C, "groups != 1 not implemented"  # TODO(synk): grouped conv
    # TODO(synk): dilation != 1 not implemented (module default is 1).
    sh, sw = stride
    ph, pw = padding
    OH = (H + 2 * ph - kh) // sh + 1
    OW = (W + 2 * pw - kw) // sw + 1
    Hp, Wp = H + 2 * ph, W + 2 * pw
    K = Wp * C
    Kpad = pl.cdiv(K, _LANE) * _LANE                  # lane-aligned MXU K dim
    L = Cout * OW                                     # lane-dense output dim

    in_dtype = jnp.bfloat16 if use_bf16 else jnp.float32
    isize = 2 if use_bf16 else 4

    # Padded input, NHWC-flattened; last dim zero-padded to Kpad.  One pass
    # over x, no kh*kw im2col amplification.
    xp = jnp.pad(x, ((0, 0), (0, 0), (ph, ph), (pw, pw)))
    xr = xp.transpose(0, 2, 3, 1).reshape(N, Hp, K)
    if Kpad != K:
        xr = jnp.pad(xr, ((0, 0), (0, 0), (0, Kpad - K)))

    # Banded weights (kh, Kpad, L); padded rows are zero (contribute nothing).
    # TODO(synk): for large W, add an OW-tile grid axis with a windowed
    # contraction ((OW_tile*sw+kw-1)*C lanes via pl.ds) so the resident
    # banded-weight VMEM stays bounded instead of scaling ~W*OW.
    wb_mu = _band_weights(weight.astype(jnp.float32),
                          kh, kw, C, Cout, Wp, OW, sw)
    wb_var = _band_weights(jnp.exp(w_logvar).astype(jnp.float32),
                           kh, kw, C, Cout, Wp, OW, sw)
    if Kpad != K:
        wb_mu = jnp.pad(wb_mu, ((0, 0), (0, Kpad - K), (0, 0)))
        wb_var = jnp.pad(wb_var, ((0, 0), (0, Kpad - K), (0, 0)))

    if bias is None:
        bias_l = jnp.zeros((1, L), jnp.float32)
    else:
        bias_l = jnp.repeat(bias.astype(jnp.float32), OW).reshape(1, L)

    # Noise / output live in (N, OH, Cout*OW): lane-dense last dim.
    # TODO(synk): the noise stream could be generated in-kernel with
    # pltpu.prng_seed/prng_random_bits to drop one output-sized HBM read.
    noise_l = noise_nchw.transpose(0, 2, 1, 3).reshape(N, OH, L).astype(jnp.float32)

    if use_bf16:
        # bf16 matmul streams (MXU is bf16-native on v5e/v6e/v7x); f32
        # accumulation and the clamp/sqrt/noise/bias tail stay f32.
        xr = xr.astype(jnp.bfloat16)
        wb_mu = wb_mu.astype(jnp.bfloat16)
        wb_var = wb_var.astype(jnp.bfloat16)

    # Batch tiling: TB images per grid step -> MXU M dim is TB*OH.
    TB = _pick_batch_tile(N, OH, Hp, Kpad, isize)
    steps = pl.cdiv(N, TB)
    Npad = steps * TB
    if Npad != N:
        xr = jnp.pad(xr, ((0, Npad - N), (0, 0), (0, 0)))
        noise_l = jnp.pad(noise_l, ((0, Npad - N), (0, 0), (0, 0)))

    # Explicit VMEM budget: resident weights (double-buffered by default) +
    # double-buffered x/noise/out tiles + scratch, with headroom.
    # TODO(synk): pipeline_mode=pl.Buffered(1) on the constant-index weight /
    # bias specs would drop their unused second buffer (extra v7x headroom).
    w_bytes = 2 * kh * Kpad * L * isize
    tile_bytes = (TB * Hp * Kpad * isize              # x tile
                  + TB * OH * L * 4                   # noise tile
                  + TB * OH * L * 4)                  # out tile
    scratch_bytes = 2 * TB * OH * L * 4
    vmem_need = 2 * w_bytes + 2 * tile_bytes + scratch_bytes + 2 * L * 4
    vmem_limit = int(min(max(2 * vmem_need + (4 << 20), 32 << 20), 56 << 20))

    flops = 2 * 2 * Npad * OH * Kpad * L * kh         # two MXU dots per ki
    bytes_accessed = int(xr.size * isize + (wb_mu.size + wb_var.size) * isize
                         + noise_l.size * 4 + Npad * OH * L * 4 + L * 4)

    kernel = functools.partial(_vdrop_conv_kernel, kh=kh, oh=OH, sh=sh, tb=TB)

    out_l = pl.pallas_call(
        kernel,
        out_shape=jax.ShapeDtypeStruct((Npad, OH, L), jnp.float32),
        grid_spec=pltpu.PrefetchScalarGridSpec(
            num_scalar_prefetch=0,
            grid=(steps,),
            in_specs=[
                pl.BlockSpec((TB, Hp, Kpad), lambda n: (n, 0, 0)),
                # Constant index_maps -> DMA'd once, VMEM-resident over grid.
                pl.BlockSpec((kh, Kpad, L), lambda n: (0, 0, 0)),
                pl.BlockSpec((kh, Kpad, L), lambda n: (0, 0, 0)),
                pl.BlockSpec((1, L), lambda n: (0, 0)),
                pl.BlockSpec((TB, OH, L), lambda n: (n, 0, 0)),
            ],
            out_specs=pl.BlockSpec((TB, OH, L), lambda n: (n, 0, 0)),
            scratch_shapes=[pltpu.VMEM((TB * OH, L), jnp.float32),
                            pltpu.VMEM((TB * OH, L), jnp.float32)],
        ),
        compiler_params=pltpu.CompilerParams(
            dimension_semantics=("parallel",),
            vmem_limit_bytes=vmem_limit),
        cost_estimate=pl.CostEstimate(
            flops=int(flops),
            transcendentals=int(Npad * OH * L),
            bytes_accessed=bytes_accessed),
    )(xr, wb_mu, wb_var, bias_l, noise_l)

    out_l = out_l[:N]
    # (N, OH, Cout*OW) -> (N, Cout, OH, OW): one cheap output-sized transpose.
    return out_l.reshape(N, OH, Cout, OW).transpose(0, 2, 1, 3)


def _reference(x, weight, w_logvar, bias, noise_nchw, stride, padding):
    """Plain-JAX reference of the same forward (same noise)."""
    dn = ("NCHW", "OIHW", "NCHW")
    pad = ((padding[0], padding[0]), (padding[1], padding[1]))
    conv = lambda inp, w: jax.lax.conv_general_dilated(
        inp, w, window_strides=stride, padding=pad, dimension_numbers=dn)
    y_var = conv(x * x, jnp.exp(w_logvar))
    y_sigma = jnp.sqrt(jnp.maximum(y_var, EPSILON))
    y_mu = conv(x, weight) + bias.reshape(1, -1, 1, 1)
    return y_sigma * noise_nchw + y_mu


if __name__ == "__main__":
    # Module config: VDropConv2d(in_channels=4, out_channels=8, kernel_size=3,
    #                            stride=1, padding=1, bias=True)
    N, Cin, H, W = 4, 4, 16, 16
    Cout, kh, kw = 8, 3, 3
    stride, padding = (1, 1), (1, 1)

    key = jax.random.PRNGKey(0)
    k_x, k_w, k_n = jax.random.split(key, 3)

    # Deterministic parameter init (mirrors __init__):
    #   weight ~ kaiming_normal_(mode='fan_out'): std = sqrt(2 / (Cout*kh*kw))
    #   w_logvar = -10, bias = 0
    fan_out = Cout * kh * kw
    weight = jax.random.normal(k_w, (Cout, Cin, kh, kw), jnp.float32) * jnp.sqrt(
        2.0 / fan_out)
    w_logvar = jnp.full((Cout, Cin, kh, kw), -10.0, jnp.float32)
    bias = jnp.zeros((Cout,), jnp.float32)

    x = jax.random.normal(k_x, (N, Cin, H, W), jnp.float32)

    OH = (H + 2 * padding[0] - kh) // stride[0] + 1
    OW = (W + 2 * padding[1] - kw) // stride[1] + 1
    noise_nchw = jax.random.normal(k_n, (N, Cout, OH, OW), jnp.float32)

    ref = _reference(x, weight, w_logvar, bias, noise_nchw, stride, padding)

    # f32 matmul-stream path: tight numerical check vs. the JAX reference.
    out_f32 = jax.block_until_ready(vdrop_conv2d_forward(
        x, weight, w_logvar, bias, noise_nchw,
        stride=stride, padding=padding, use_bf16=False))
    assert out_f32.shape == (N, Cout, OH, OW)
    assert jnp.allclose(out_f32, ref, atol=1e-4, rtol=1e-4), float(
        jnp.max(jnp.abs(out_f32 - ref)))

    # bf16 matmul-stream path (the default; f32 accumulation + f32 tail):
    # looser tolerance appropriate for bf16-rounded inputs.
    out_bf16 = jax.block_until_ready(vdrop_conv2d_forward(
        x, weight, w_logvar, bias, noise_nchw,
        stride=stride, padding=padding, use_bf16=True))
    assert out_bf16.shape == (N, Cout, OH, OW)
    assert jnp.allclose(out_bf16, ref, atol=6e-2, rtol=6e-2), float(
        jnp.max(jnp.abs(out_bf16 - ref)))

    print("KERNEL_OK")
</pallas_src>

<mosaic_0001>
module attributes {stable_mosaic.version = 11 : i64} {
  func.func @_vdrop_conv_kernel(%arg0: i32, %arg1: memref<2x18x128xf32, #tpu.memory_space<vmem>>, %arg2: memref<3x128x128xf32, #tpu.memory_space<vmem>>, %arg3: memref<3x128x128xf32, #tpu.memory_space<vmem>>, %arg4: memref<1x128xf32, #tpu.memory_space<vmem>>, %arg5: memref<2x16x128xf32, #tpu.memory_space<vmem>>, %arg6: memref<2x16x128xf32, #tpu.memory_space<vmem>>, %arg7: memref<32x128xf32, #tpu.memory_space<vmem>>, %arg8: memref<32x128xf32, #tpu.memory_space<vmem>>) attributes {dimension_semantics = [#tpu.dimension_semantics<parallel>], iteration_bounds = array<i64: 2>, scalar_prefetch = 0 : i64, scratch_operands = 2 : i64, tpu.core_type = #tpu.core_type<tc>, window_params = [{transform_indices = @transform_0, window_bounds = array<i64: 2, 18, 128>}, {pipeline_mode = #tpu.pipeline_mode<synchronous>, transform_indices = @transform_1, window_bounds = array<i64: 3, 128, 128>}, {pipeline_mode = #tpu.pipeline_mode<synchronous>, transform_indices = @transform_2, window_bounds = array<i64: 3, 128, 128>}, {pipeline_mode = #tpu.pipeline_mode<synchronous>, transform_indices = @transform_3, window_bounds = array<i64: 1, 128>}, {transform_indices = @transform_4, window_bounds = array<i64: 2, 16, 128>}, {transform_indices = @transform_5, window_bounds = array<i64: 2, 16, 128>}]} {
    %c0 = arith.constant 0 : index
    %c0_0 = arith.constant 0 : index
    %c0_1 = arith.constant 0 : index
    %0 = vector.load %arg1[%c0, %c0_0, %c0_1] : memref<2x18x128xf32, #tpu.memory_space<vmem>>, vector<2x18x128xf32>
    %1 = arith.mulf %0, %0 : vector<2x18x128xf32>
    %2 = vector.extract_strided_slice %0 {offsets = [0, 0, 0], sizes = [2, 16, 128], strides = [1, 1, 1]} : vector<2x18x128xf32> to vector<2x16x128xf32>
    %3 = vector.shape_cast %2 : vector<2x16x128xf32> to vector<32x128xf32>
    %4 = vector.extract_strided_slice %1 {offsets = [0, 0, 0], sizes = [2, 16, 128], strides = [1, 1, 1]} : vector<2x18x128xf32> to vector<2x16x128xf32>
    %5 = vector.shape_cast %4 : vector<2x16x128xf32> to vector<32x128xf32>
    %c0_2 = arith.constant 0 : index
    %c0_3 = arith.constant 0 : index
    %c0_4 = arith.constant 0 : index
    %6 = vector.load %arg2[%c0_2, %c0_3, %c0_4] : memref<3x128x128xf32, #tpu.memory_space<vmem>>, vector<1x128x128xf32>
    %7 = vector.shape_cast %6 : vector<1x128x128xf32> to vector<128x128xf32>
    %cst = arith.constant dense<0.000000e+00> : vector<32x128xf32>
    %8 = tpu.matmul %3, %7, %cst {dimension_numbers = #tpu.dot_dimension_numbers<[1], [0], [0], [1], [0, 0, 1, 1], [], []>} : vector<32x128xf32>, vector<128x128xf32>, vector<32x128xf32> -> vector<32x128xf32>
    %c0_5 = arith.constant 0 : index
    %c0_6 = arith.constant 0 : index
    %c0_7 = arith.constant 0 : index
    %9 = vector.load %arg3[%c0_5, %c0_6, %c0_7] : memref<3x128x128xf32, #tpu.memory_space<vmem>>, vector<1x128x128xf32>
    %10 = vector.shape_cast %9 : vector<1x128x128xf32> to vector<128x128xf32>
    %cst_8 = arith.constant dense<0.000000e+00> : vector<32x128xf32>
    %11 = tpu.matmul %5, %10, %cst_8 {dimension_numbers = #tpu.dot_dimension_numbers<[1], [0], [0], [1], [0, 0, 1, 1], [], []>} : vector<32x128xf32>, vector<128x128xf32>, vector<32x128xf32> -> vector<32x128xf32>
    %c0_9 = arith.constant 0 : index
    %c0_10 = arith.constant 0 : index
    %12 = vector.load %arg7[%c0_9, %c0_10] : memref<32x128xf32, #tpu.memory_space<vmem>>, vector<32x128xf32>
    tpu.vector_store %arg7[%c0_9, %c0_10], %8 {strides = array<i32>} : memref<32x128xf32, #tpu.memory_space<vmem>>, vector<32x128xf32>,
    %c0_11 = arith.constant 0 : index
    %c0_12 = arith.constant 0 : index
    %13 = vector.load %arg8[%c0_11, %c0_12] : memref<32x128xf32, #tpu.memory_space<vmem>>, vector<32x128xf32>
    tpu.vector_store %arg8[%c0_11, %c0_12], %11 {strides = array<i32>} : memref<32x128xf32, #tpu.memory_space<vmem>>, vector<32x128xf32>,
    %14 = vector.extract_strided_slice %0 {offsets = [0, 1, 0], sizes = [2, 16, 128], strides = [1, 1, 1]} : vector<2x18x128xf32> to vector<2x16x128xf32>
    %15 = vector.shape_cast %14 : vector<2x16x128xf32> to vector<32x128xf32>
    %16 = vector.extract_strided_slice %1 {offsets = [0, 1, 0], sizes = [2, 16, 128], strides = [1, 1, 1]} : vector<2x18x128xf32> to vector<2x16x128xf32>
    %17 = vector.shape_cast %16 : vector<2x16x128xf32> to vector<32x128xf32>
    %c1 = arith.constant 1 : index
    %c0_13 = arith.constant 0 : index
    %c0_14 = arith.constant 0 : index
    %18 = vector.load %arg2[%c1, %c0_13, %c0_14] : memref<3x128x128xf32, #tpu.memory_space<vmem>>, vector<1x128x128xf32>
    %19 = vector.shape_cast %18 : vector<1x128x128xf32> to vector<128x128xf32>
    %cst_15 = arith.constant dense<0.000000e+00> : vector<32x128xf32>
    %20 = tpu.matmul %15, %19, %cst_15 {dimension_numbers = #tpu.dot_dimension_numbers<[1], [0], [0], [1], [0, 0, 1, 1], [], []>} : vector<32x128xf32>, vector<128x128xf32>, vector<32x128xf32> -> vector<32x128xf32>
    %c1_16 = arith.constant 1 : index
    %c0_17 = arith.constant 0 : index
    %c0_18 = arith.constant 0 : index
    %21 = vector.load %arg3[%c1_16, %c0_17, %c0_18] : memref<3x128x128xf32, #tpu.memory_space<vmem>>, vector<1x128x128xf32>
    %22 = vector.shape_cast %21 : vector<1x128x128xf32> to vector<128x128xf32>
    %cst_19 = arith.constant dense<0.000000e+00> : vector<32x128xf32>
    %23 = tpu.matmul %17, %22, %cst_19 {dimension_numbers = #tpu.dot_dimension_numbers<[1], [0], [0], [1], [0, 0, 1, 1], [], []>} : vector<32x128xf32>, vector<128x128xf32>, vector<32x128xf32> -> vector<32x128xf32>
    %c0_20 = arith.constant 0 : index
    %c0_21 = arith.constant 0 : index
    %24 = vector.load %arg7[%c0_20, %c0_21] : memref<32x128xf32, #tpu.memory_space<vmem>>, vector<32x128xf32>
    %25 = arith.addf %24, %20 : vector<32x128xf32>
    %c0_22 = arith.constant 0 : index
    %c0_23 = arith.constant 0 : index
    %26 = vector.load %arg7[%c0_22, %c0_23] : memref<32x128xf32, #tpu.memory_space<vmem>>, vector<32x128xf32>
    tpu.vector_store %arg7[%c0_22, %c0_23], %25 {strides = array<i32>} : memref<32x128xf32, #tpu.memory_space<vmem>>, vector<32x128xf32>,
    %c0_24 = arith.constant 0 : index
    %c0_25 = arith.constant 0 : index
    %27 = vector.load %arg8[%c0_24, %c0_25] : memref<32x128xf32, #tpu.memory_space<vmem>>, vector<32x128xf32>
    %28 = arith.addf %27, %23 : vector<32x128xf32>
    %c0_26 = arith.constant 0 : index
    %c0_27 = arith.constant 0 : index
    %29 = vector.load %arg8[%c0_26, %c0_27] : memref<32x128xf32, #tpu.memory_space<vmem>>, vector<32x128xf32>
    tpu.vector_store %arg8[%c0_26, %c0_27], %28 {strides = array<i32>} : memref<32x128xf32, #tpu.memory_space<vmem>>, vector<32x128xf32>,
    %30 = vector.extract_strided_slice %0 {offsets = [0, 2, 0], sizes = [2, 16, 128], strides = [1, 1, 1]} : vector<2x18x128xf32> to vector<2x16x128xf32>
    %31 = vector.shape_cast %30 : vector<2x16x128xf32> to vector<32x128xf32>
    %32 = vector.extract_strided_slice %1 {offsets = [0, 2, 0], sizes = [2, 16, 128], strides = [1, 1, 1]} : vector<2x18x128xf32> to vector<2x16x128xf32>
    %33 = vector.shape_cast %32 : vector<2x16x128xf32> to vector<32x128xf32>
    %c2 = arith.constant 2 : index
    %c0_28 = arith.constant 0 : index
    %c0_29 = arith.constant 0 : index
    %34 = vector.load %arg2[%c2, %c0_28, %c0_29] : memref<3x128x128xf32, #tpu.memory_space<vmem>>, vector<1x128x128xf32>
    %35 = vector.shape_cast %34 : vector<1x128x128xf32> to vector<128x128xf32>
    %cst_30 = arith.constant dense<0.000000e+00> : vector<32x128xf32>
    %36 = tpu.matmul %31, %35, %cst_30 {dimension_numbers = #tpu.dot_dimension_numbers<[1], [0], [0], [1], [0, 0, 1, 1], [], []>} : vector<32x128xf32>, vector<128x128xf32>, vector<32x128xf32> -> vector<32x128xf32>
    %c2_31 = arith.constant 2 : index
    %c0_32 = arith.constant 0 : index
    %c0_33 = arith.constant 0 : index
    %37 = vector.load %arg3[%c2_31, %c0_32, %c0_33] : memref<3x128x128xf32, #tpu.memory_space<vmem>>, vector<1x128x128xf32>
    %38 = vector.shape_cast %37 : vector<1x128x128xf32> to vector<128x128xf32>
    %cst_34 = arith.constant dense<0.000000e+00> : vector<32x128xf32>
    %39 = tpu.matmul %33, %38, %cst_34 {dimension_numbers = #tpu.dot_dimension_numbers<[1], [0], [0], [1], [0, 0, 1, 1], [], []>} : vector<32x128xf32>, vector<128x128xf32>, vector<32x128xf32> -> vector<32x128xf32>
    %c0_35 = arith.constant 0 : index
    %c0_36 = arith.constant 0 : index
    %40 = vector.load %arg7[%c0_35, %c0_36] : memref<32x128xf32, #tpu.memory_space<vmem>>, vector<32x128xf32>
    %41 = arith.addf %40, %36 : vector<32x128xf32>
    %c0_37 = arith.constant 0 : index
    %c0_38 = arith.constant 0 : index
    %42 = vector.load %arg7[%c0_37, %c0_38] : memref<32x128xf32, #tpu.memory_space<vmem>>, vector<32x128xf32>
    tpu.vector_store %arg7[%c0_37, %c0_38], %41 {strides = array<i32>} : memref<32x128xf32, #tpu.memory_space<vmem>>, vector<32x128xf32>,
    %c0_39 = arith.constant 0 : index
    %c0_40 = arith.constant 0 : index
    %43 = vector.load %arg8[%c0_39, %c0_40] : memref<32x128xf32, #tpu.memory_space<vmem>>, vector<32x128xf32>
    %44 = arith.addf %43, %39 : vector<32x128xf32>
    %c0_41 = arith.constant 0 : index
    %c0_42 = arith.constant 0 : index
    %45 = vector.load %arg8[%c0_41, %c0_42] : memref<32x128xf32, #tpu.memory_space<vmem>>, vector<32x128xf32>
    tpu.vector_store %arg8[%c0_41, %c0_42], %44 {strides = array<i32>} : memref<32x128xf32, #tpu.memory_space<vmem>>, vector<32x128xf32>,
    %c0_43 = arith.constant 0 : index
    %c0_44 = arith.constant 0 : index
    %46 = vector.load %arg8[%c0_43, %c0_44] : memref<32x128xf32, #tpu.memory_space<vmem>>, vector<32x128xf32>
    %cst_45 = arith.constant 9.99999993E-9 : f32
    %47 = vector.broadcast %cst_45 : f32 to vector<32x128xf32>
    %48 = arith.maximumf %46, %47 : vector<32x128xf32>
    %49 = math.sqrt %48 : vector<32x128xf32>
    %c0_46 = arith.constant 0 : index
    %c0_47 = arith.constant 0 : index
    %c0_48 = arith.constant 0 : index
    %50 = vector.load %arg5[%c0_46, %c0_47, %c0_48] : memref<2x16x128xf32, #tpu.memory_space<vmem>>, vector<2x16x128xf32>
    %51 = vector.shape_cast %50 : vector<2x16x128xf32> to vector<32x128xf32>
    %52 = arith.mulf %49, %51 : vector<32x128xf32>
    %c0_49 = arith.constant 0 : index
    %c0_50 = arith.constant 0 : index
    %53 = vector.load %arg7[%c0_49, %c0_50] : memref<32x128xf32, #tpu.memory_space<vmem>>, vector<32x128xf32>
    %54 = arith.addf %52, %53 : vector<32x128xf32>
    %c0_51 = arith.constant 0 : index
    %c0_52 = arith.constant 0 : index
    %55 = vector.load %arg4[%c0_51, %c0_52] : memref<1x128xf32, #tpu.memory_space<vmem>>, vector<1x128xf32>
    %56 = vector.broadcast %55 : vector<1x128xf32> to vector<32x128xf32>
    %57 = arith.addf %54, %56 : vector<32x128xf32>
    %58 = vector.shape_cast %57 : vector<32x128xf32> to vector<2x16x128xf32>
    %c0_53 = arith.constant 0 : index
    %c0_54 = arith.constant 0 : index
    %c0_55 = arith.constant 0 : index
    %59 = vector.load %arg6[%c0_53, %c0_54, %c0_55] : memref<2x16x128xf32, #tpu.memory_space<vmem>>, vector<2x16x128xf32>
    tpu.vector_store %arg6[%c0_53, %c0_54, %c0_55], %58 {strides = array<i32>} : memref<2x16x128xf32, #tpu.memory_space<vmem>>, vector<2x16x128xf32>,
    return
  }
  func.func @transform_0(%arg0: i32) -> (i32, i32, i32) {
    %c0_i32 = arith.constant 0 : i32
    %c0_i32_0 = arith.constant 0 : i32
    %c0_i32_1 = arith.constant 0 : i32
    return %arg0, %c0_i32, %c0_i32_0 : i32, i32, i32
  }
  func.func @transform_1(%arg0: i32) -> (i32, i32, i32) {
    %c0_i32 = arith.constant 0 : i32
    %c0_i32_0 = arith.constant 0 : i32
    %c0_i32_1 = arith.constant 0 : i32
    %c0_i32_2 = arith.constant 0 : i32
    return %c0_i32, %c0_i32_0, %c0_i32_1 : i32, i32, i32
  }
  func.func @transform_2(%arg0: i32) -> (i32, i32, i32) {
    %c0_i32 = arith.constant 0 : i32
    %c0_i32_0 = arith.constant 0 : i32
    %c0_i32_1 = arith.constant 0 : i32
    %c0_i32_2 = arith.constant 0 : i32
    return %c0_i32, %c0_i32_0, %c0_i32_1 : i32, i32, i32
  }
  func.func @transform_3(%arg0: i32) -> (i32, i32) {
    %c0_i32 = arith.constant 0 : i32
    %c0_i32_0 = arith.constant 0 : i32
    %c0_i32_1 = arith.constant 0 : i32
    return %c0_i32, %c0_i32_0 : i32, i32
  }
  func.func @transform_4(%arg0: i32) -> (i32, i32, i32) {
    %c0_i32 = arith.constant 0 : i32
    %c0_i32_0 = arith.constant 0 : i32
    %c0_i32_1 = arith.constant 0 : i32
    return %arg0, %c0_i32, %c0_i32_0 : i32, i32, i32
  }
  func.func @transform_5(%arg0: i32) -> (i32, i32, i32) {
    %c0_i32 = arith.constant 0 : i32
    %c0_i32_0 = arith.constant 0 : i32
    %c0_i32_1 = arith.constant 0 : i32
    return %arg0, %c0_i32, %c0_i32_0 : i32, i32, i32
  }
}

</mosaic_0001>

<bundles_post_ra>
// kernel: tpu_custom_call.1
= control target key start
LH: loop header
LB: loop body
LE: loop exit
PB: predicated region body
PF: predicated region fallthrough
CT: control target
= control target key end

     0   :  { %10 = vsyncpa [#allocation5], 0  ;;  %s2082_s0 = inlined_call_operand.vmem [shape: f32[4,18,128], index: 0, kind: input, shape index: {}]   ;;  %s2083_s1 = inlined_call_operand.hbm [shape: f32[3,128,128], index: 1, kind: input, shape index: {}]   ;;  %s2084_s2 = inlined_call_operand.hbm [shape: f32[3,128,128], index: 2, kind: input, shape index: {}]   ;;  %s2085_s3 = inlined_call_operand.vmem [shape: f32[1,128], index: 3, kind: input, shape index: {}]   ;;  %s2086_s4 = inlined_call_operand.vmem [shape: f32[4,16,128], index: 4, kind: input, shape index: {}]   ;;  %s2087_s5 = inlined_call_operand.hbm [shape: f32[4,16,128], index: 5, kind: output, shape index: {}]  }
   0x1   :  { %11 = vsyncpa [#allocation8], 0 }
   0x2   :  { %12 = vsyncpa [#allocation6], 0 }
   0x3   :  { %14 = vsyncpa [#allocation6 + $0x1], 0  ;;  %s1814_s18 = smov 0   ;;  %s1816_s19 = smov 0  }
   0x4   :  { %s1818_s20 = smov 0   ;;  %s1820_s21 = smov 0  }
   0x5 LB: > { %s1835_s22 = sadd.s32 4294967295, %s1775_s21   ;;  %s1210_s23 = sadd.s32 4294967294, %s1775_s21   ;;  %s1775_s21 = sphi %s1820_s21, %s2101_s21   ;;  %s1771_s20 = sphi %s1818_s20, %s2100_s20   ;;  %s1767_s19 = sphi %s1816_s19, %s2099_s19   ;;  %s1763_s18 = sphi %s1814_s18, %s2098_s18  }
   0x6   : > { %s1839_s24 = sadd.s32 1, %s1775_s21   ;;  %s142_s25 = sadd.s32 1, %s1771_s20 }
   0x7   : > { %s139_s26 = ssub.s32 %s1775_s21, %s1839_s24  ;;  %p152_p0 = scmp.ne.s32.totalorder %s1771_s20, %s1767_s19 }
   0x8   : > { %p140_p1 = scmp.eq.s32.totalorder %s139_s26, 0  ;;  %p153_p2 = scmp.eq.s32.totalorder %s1835_s22, 1 }
   0x9   : > { %p158_p3 = scmp.ne.s32.totalorder %s1767_s19, %s1763_s18  ;;  %p159_p4 = scmp.eq.s32.totalorder %s1210_s23, 1 }
   0xa   : > { %s1850_s27 = scalar_select %p140_p1, %s1771_s20, %s142_s25  }
   0xb   : > { %p1852_p5 = por %p153_p2, %p152_p0  ;;  %p1856_p6 = por %p159_p4, %p158_p3 }
   0xc   : > { %p1211_p7 = scmp.ge.s32.totalorder %s1775_s21, 1  ;;  %p166_p8 = scmp.lt.s32.totalorder %s1775_s21, 3 }
   0xd   : > { %s2090_s29 = scalar_select %p1856_p6, 1, 0 }
   0xe   : > { %p2088_p9 = scmp.eq.s32.totalorder %s1835_s22, 0  ;;  %p1863_p10 = pnand %p1211_p7, %p166_p8 }
   0xf   : > { %s1777_s6 = smov [#allocation4]   ;;  %s1778_s9 = smov [#allocation7]  }
  0x10   : > { %s178_s7 = sshll.u32 %s1777_s6, 4  ;;  %p1593_p11 = pneg %p1863_p10  ;;  %s179_s7 = int_to_ptr.vmem [resolvable:$true] %s178_s7 }
  0x11   : > { %s191_s10 = sshll.u32 %s1778_s9, 4  ;;  %s1666_s11 = scalar_lea.vmem %s179_s7, 6144  ;;  %s192_s10 = int_to_ptr.vmem [resolvable:$true] %s191_s10 }
  0x12   : > { %p1871_p12 = pnand %p2088_p9, %p1593_p11  ;;  %p1667_p0 = scmp.ne.s32.totalorder %s179_s7, %s1666_s11 }
  0x13   : > { %p1674_p3 = scmp.lt.s32.totalorder %s179_s7, %s179_s7  ;;  %p1675_p4 = scmp.lt.s32.totalorder %s1666_s11, %s1666_s11 }
  0x14   : > { %p1657_p13 = pneg %p1871_p12 }
  0x15   : > { %p1676_p7 = por %p1675_p4, %p1674_p3 }
  0x16   : > { %p1669_p1 = pnand %p1667_p0, %p1657_p13 }
  0x18   : > { %p1670_p2 = pneg %p1669_p1 }
  0x1a   : > { %p1677_p8 = pnand %p1676_p7, %p1670_p2 }
  0x1c   : > { %1680 = shalt.err (!%p1677_p8)
}
  0x1d   : > { %s1779_s12 = smov 128   ;;  %s1780_s13 = smov 8  }
  0x1e   : > { %1596 = dma.hbm_to_vmem [thread:$0]  (!%p1871_p12), %s2083_s1, 6144, %s179_s7, [#allocation5], %s1779_s12, %s1779_s12, %s1780_s13  }
  0x1f   : > { %s1692_s16 = scalar_lea.vmem %s192_s10, 6144  ;;  %p1700_p9 = scmp.lt.s32.totalorder %s192_s10, %s192_s10 }
  0x20   : > { %p1693_p11 = scmp.ne.s32.totalorder %s192_s10, %s1692_s16  ;;  %p1701_p6 = scmp.lt.s32.totalorder %s1692_s16, %s1692_s16 }
  0x22   : > { %p1695_p0 = pnand %p1693_p11, %p1657_p13  ;;  %p1702_p3 = por %p1701_p6, %p1700_p9 }
  0x24   : > { %p1696_p1 = pneg %p1695_p0 }
  0x26   : > { %p1703_p2 = pnand %p1702_p3, %p1696_p1 }
  0x28   : > { %1706 = shalt.err (!%p1703_p2)
}
  0x29   : > { %1599 = dma.hbm_to_vmem [thread:$0]  (!%p1871_p12), %s2084_s2, 6144, %s192_s10, [#allocation8], %s1779_s12, %s1779_s12, %s1780_s13  }
  0x2a   : > { %230 = sbr.rel (%p1863_p10) target bundleno = 399 (0x18f), region = 40  ;;  %p2093_p4 = scmp.eq.s32.totalorder (!%p1863_p10), %s1835_s22, 0 }
  0x2f   : > { %1750 = dma.done.wait (%p2093_p4), [#allocation5], 6144   ;;  %p2094_p13 = pmov %p2093_p4 }
  0x30   : > { %p2095_p7 = pmov %p2093_p4 }
  0x31   : > { %1752 = vsyncadd (%p2094_p13), [#allocation5], 4294961152 }
  0x32   : > { %1754 = dma.done.wait (%p2095_p7), [#allocation8], 6144   ;;  %p2096_p6 = pmov %p2093_p4 }
  0x33   : > { %s1219_s25 = sshll.u32 %s1835_s22, 1  ;;  %v311_v0 = vld [vmem:[#allocation4 + $0x78] sm:$0xff]  ;;  %v310_v2 = vld [vmem:[#allocation4 + $0x70] sm:$0xff]  ;;  %v309_v4 = vld [vmem:[#allocation4 + $0x68] sm:$0xff]  ;;  %vm775_vm0 = vcmask 1045504   ;;  %vm512_vm1 = vcmask 1046528  }
  0x34   : > { %1756 = vsyncadd (%p2096_p6), [#allocation8], 4294961152  ;;  %p270_p9 = scmp.lt.s32.totalorder %s1219_s25, 3  ;;  %v412_v1 = vld [vmem:[#allocation7 + $0x78] sm:$0xff]  ;;  %1354 = vmatprep.subr.mxu0 %v311_v0  ;;  %v411_v3 = vld [vmem:[#allocation7 + $0x70] sm:$0xff]  ;;  %s266_s12 = sand.u32 1, %s1767_s19  }
  0x35   : > { %1392 = vmatprep.subr.mxu1 %v412_v1  ;;  %1355 = vmatpush3.msra.mxu0 %v311_v0  ;;  %v410_v5 = vld [vmem:[#allocation7 + $0x68] sm:$0xff]  ;;  %v308_v6 = vld [vmem:[#allocation4 + $0x60] sm:$0xff]  ;;  %v307_v8 = vld [vmem:[#allocation4 + $0x58] sm:$0xff]  ;;  %s1218_s13 = sshll.u32 %s266_s12, 5  ;;  %s1233_s17 = sshll.u32 %s1835_s22, 9 }
  0x36   : > { %s2103_s25 = smov (!%p270_p9, %s1219_s25), 3  ;;  %1393 = vmatpush3.msra.mxu1 %v412_v1  ;;  %1356 = vmatprep.subr.mxu0 %v310_v2  ;;  %v409_v7 = vld [vmem:[#allocation7 + $0x60] sm:$0xff]  ;;  %v408_v9 = vld [vmem:[#allocation7 + $0x58] sm:$0xff]  ;;  %v306_v10 = vld [vmem:[#allocation4 + $0x50] sm:$0xff]  ;;  %s268_s16 = scalar_lea.vmem [#allocation9], %s1218_s13 }
  0x37   : > { %1394 = vmatprep.subr.mxu1 %v411_v3  ;;  %s1582_s26 = smul.u32 24, %s2103_s25  ;;  %1357 = vmatpush3.msra.mxu0 %v310_v2  ;;  %v407_v11 = vld [vmem:[#allocation7 + $0x50] sm:$0xff]  ;;  %v305_v12 = vld [vmem:[#allocation4 + $0x48] sm:$0xff]  ;;  %v304_v18 = vld [vmem:[#allocation4 + $0x40] sm:$0xff]  ;;  %s1231_s8 = sshll.u32 %s2103_s25, 4 }
  0x38   : > { %1395 = vmatpush3.msra.mxu1 %v411_v3  ;;  %1358 = vmatprep.subr.mxu0 %v309_v4  ;;  %v406_v13 = vld [vmem:[#allocation7 + $0x48] sm:$0xff]  ;;  %v405_v19 = vld [vmem:[#allocation7 + $0x40] sm:$0xff]  ;;  %v303_v23 = vld [vmem:[#allocation4 + $0x38] sm:$0xff]  ;;  %s2020_s11 = scalar_lea.vmem %s2086_s4, %s1231_s8  ;;  %s1114_s23 = sshll.u32 %s268_s16, 4  ;;  %s2038_s23 = int_to_ptr.vmem [resolvable:$true] %s1114_s23 }
  0x39   : > { %1396 = vmatprep.subr.mxu1 %v410_v5  ;;  %1359 = vmatpush3.msra.mxu0 %v309_v4  ;;  %s1910_s7 = scalar_lea.vmem %s2082_s0, %s1582_s26  ;;  %v404_v24 = vld [vmem:[#allocation7 + $0x38] sm:$0xff]  ;;  %v302_v27 = vld [vmem:[#allocation4 + $0x30] sm:$0xff]  ;;  %v301_v30 = vld [vmem:[#allocation4 + $0x28] sm:$0xff]  ;;  %s2036_s30 = scalar_lea.hbm %s2087_s5, %s1233_s17 }
  0x3a   : > { %1397 = vmatpush3.msra.mxu1 %v410_v5  ;;  %1360 = vmatprep.subr.mxu0 %v308_v6  ;;  %v1913_v14 = vld [vmem:[%s1910_s7] sm:$0xff]  ;;  %v1920_v16 = vld [vmem:[%s1910_s7 + $0x8] sm:$0xff]  ;;  %v403_v28 = vld [vmem:[#allocation7 + $0x30] sm:$0xff]  ;;  %s2042_s22 = scalar_lea.sflag [#allocation6], %s266_s12  ;;  %s1707_s6 = scalar_lea.vmem %s2038_s23, 512 }
  0x3b   : > { %1398 = vmatprep.subr.mxu1 %v409_v7  ;;  %1361 = vmatpush3.msra.mxu0 %v308_v6  ;;  %v1917_v15 = vmul.f32 %v1913_v14, %v1913_v14  ;;  %v776_v17 = vrot.slane %v1913_v14, 2  ;;  %v1925_v20 = vmul.f32 %v1920_v16, %v1920_v16  ;;  %v777_v21 = vrot.slane %v1920_v16, 2  ;;  %v402_v31 = vld [vmem:[#allocation7 + $0x28] sm:$0xff]  ;;  %v300_v32 = vld [vmem:[#allocation4 + $0x20] sm:$0xff]  ;;  %v299_v34 = vld [vmem:[#allocation4 + $0x18] sm:$0xff]  ;;  %p1708_p10 = scmp.ne.s32.totalorder %s2038_s23, %s1707_s6 }
  0x3c   : > { %1399 = vmatpush3.msra.mxu1 %v409_v7  ;;  %1362 = vmatprep.subr.mxu0 %v307_v8  ;;  %v401_v33 = vld [vmem:[#allocation7 + $0x20] sm:$0xff]  ;;  %v400_v35 = vld [vmem:[#allocation7 + $0x18] sm:$0xff]  ;;  %v298_v36 = vld [vmem:[#allocation4 + $0x10] sm:$0xff] }
  0x3d   : > { %1400 = vmatprep.subr.mxu1 %v408_v9  ;;  %1363 = vmatpush3.msra.mxu0 %v307_v8  ;;  %v790_v22 = vrot.slane %v1917_v15, 2  ;;  %v1932_v25 = vsel %vm775_vm0, %v776_v17, %v777_v21  ;;  %v791_v26 = vrot.slane %v1925_v20, 2  ;;  %v399_v37 = vld [vmem:[#allocation7 + $0x10] sm:$0xff]  ;;  %v297_v38 = vld [vmem:[#allocation4 + $0x8] sm:$0xff]  ;;  %v296_v40 = vld [vmem:[#allocation4] sm:$0xff]  ;;  %p1709_p12 = pnand %p1708_p10, %p1852_p5 }
  0x3e   : > { %1401 = vmatpush3.msra.mxu1 %v408_v9  ;;  %1364 = vmatprep.subr.mxu0 %v306_v10  ;;  %v398_v39 = vld [vmem:[#allocation7 + $0x8] sm:$0xff]  ;;  %v397_v41 = vld [vmem:[#allocation7] sm:$0xff]  ;;  %v563_v42 = vld [vmem:[#allocation4 + $0xf8] sm:$0xff] }
  0x3f   : > { %1402 = vmatprep.subr.mxu1 %v407_v11  ;;  %1365 = vmatpush3.msra.mxu0 %v306_v10  ;;  %v1938_v29 = vsel %vm775_vm0, %v790_v22, %v791_v26  ;;  %v665_v43 = vld [vmem:[#allocation7 + $0xf8] sm:$0xff]  ;;  %v562_v44 = vld [vmem:[#allocation4 + $0xf0] sm:$0xff]  ;;  %v561_v46 = vld [vmem:[#allocation4 + $0xe8] sm:$0xff]  ;;  %v534_v22 = vrot.slane %v1925_v20, 1  ;;  %p1710_p8 = pneg %p1709_p12 }
  0x40   : > { %1403 = vmatpush3.msra.mxu1 %v407_v11  ;;  %1366 = vmatprep.subr.mxu0 %v305_v12  ;;  %v664_v45 = vld [vmem:[#allocation7 + $0xf0] sm:$0xff]  ;;  %v663_v47 = vld [vmem:[#allocation7 + $0xe8] sm:$0xff]  ;;  %v560_v48 = vld [vmem:[#allocation4 + $0xe0] sm:$0xff] }
  0x41   : > { %1404 = vmatprep.subr.mxu1 %v406_v13  ;;  %1367 = vmatpush3.msra.mxu0 %v305_v12  ;;  %v662_v49 = vld [vmem:[#allocation7 + $0xe0] sm:$0xff]  ;;  %v559_v50 = vld [vmem:[#allocation4 + $0xd8] sm:$0xff]  ;;  %v558_v52 = vld [vmem:[#allocation4 + $0xd0] sm:$0xff]  ;;  %v513_v12 = vrot.slane %v1913_v14, 1 }
  0x42   : > { %1405 = vmatpush3.msra.mxu1 %v406_v13  ;;  %1368 = vmatprep.subr.mxu0 %v304_v18  ;;  %v661_v51 = vld [vmem:[#allocation7 + $0xd8] sm:$0xff]  ;;  %v660_v53 = vld [vmem:[#allocation7 + $0xd0] sm:$0xff]  ;;  %v557_v54 = vld [vmem:[#allocation4 + $0xc8] sm:$0xff]  ;;  %v514_v13 = vrot.slane %v1920_v16, 1 }
  0x43   : > { %1406 = vmatprep.subr.mxu1 %v405_v19  ;;  %1369 = vmatpush3.msra.mxu0 %v304_v18  ;;  %v659_v55 = vld [vmem:[#allocation7 + $0xc8] sm:$0xff]  ;;  %v556_v56 = vld [vmem:[#allocation4 + $0xc0] sm:$0xff]  ;;  %v555_v58 = vld [vmem:[#allocation4 + $0xb8] sm:$0xff] }
  0x44   : > { %1407 = vmatpush3.msra.mxu1 %v405_v19  ;;  %1370 = vmatprep.subr.mxu0 %v303_v23  ;;  %v658_v57 = vld [vmem:[#allocation7 + $0xc0] sm:$0xff]  ;;  %v657_v59 = vld [vmem:[#allocation7 + $0xb8] sm:$0xff]  ;;  %v554_v60 = vld [vmem:[#allocation4 + $0xb0] sm:$0xff]  ;;  %v533_v19 = vrot.slane %v1917_v15, 1 }
  0x45   : > { %1408 = vmatprep.subr.mxu1 %v404_v24  ;;  %1371 = vmatpush3.msra.mxu0 %v303_v23  ;;  %v656_v61 = vld [vmem:[#allocation7 + $0xb0] sm:$0xff]  ;;  %v553_v62 = vld [vmem:[#allocation4 + $0xa8] sm:$0xff]  ;;  %v552_v0 = vld [vmem:[#allocation4 + $0xa0] sm:$0xff] }
  0x46   : > { %1409 = vmatpush3.msra.mxu1 %v404_v24  ;;  %1372 = vmatprep.subr.mxu0 %v302_v27  ;;  %v655_v63 = vld [vmem:[#allocation7 + $0xa8] sm:$0xff]  ;;  %v654_v1 = vld [vmem:[#allocation7 + $0xa0] sm:$0xff]  ;;  %v1945_v2 = vld [vmem:[%s1910_s7 + $0x18] sm:$0xff] }
  0x47   : > { %1410 = vmatprep.subr.mxu1 %v403_v28  ;;  %1373 = vmatpush3.msra.mxu0 %v302_v27  ;;  %v551_v3 = vld [vmem:[#allocation4 + $0x98] sm:$0xff]  ;;  %v1948_v5 = vld [vmem:[%s1910_s7 + $0x20] sm:$0xff]  ;;  %v1951_v6 = vld [vmem:[%s1910_s7 + $0x10] sm:$0x3]  ;;  %v1955_v7 = vmul.f32 %v1945_v2, %v1945_v2 }
  0x48   : > { %1411 = vmatpush3.msra.mxu1 %v403_v28  ;;  %1374 = vmatprep.subr.mxu0 %v301_v30  ;;  %v653_v4 = vld [vmem:[#allocation7 + $0x98] sm:$0xff]  ;;  %v550_v8 = vld [vmem:[#allocation4 + $0x90] sm:$0xff]  ;;  %v1959_v10 = vmul.f32 %v1948_v5, %v1948_v5  ;;  %v1963_v11 = vmul.f32 %v1951_v6, %v1951_v6  ;;  %v549_v17 = vld [vmem:[#allocation4 + $0x88] sm:$0xff]  ;;  %v516_v24 = vrot.slane %v1951_v6, 1 }
  0x49   : > { %1412 = vmatprep.subr.mxu1 %v402_v31  ;;  %1375 = vmatpush3.msra.mxu0 %v301_v30  ;;  %v652_v9 = vld [vmem:[#allocation7 + $0x90] sm:$0xff]  ;;  %v651_v18 = vld [vmem:[#allocation7 + $0x88] sm:$0xff]  ;;  %v548_v27 = vld [vmem:[#allocation4 + $0x80] sm:$0xff] }
  0x4a   : > { %1413 = vmatpush3.msra.mxu1 %v402_v31  ;;  %1376 = vmatprep.subr.mxu0 %v300_v32  ;;  %v1972_v23 = vld [vmem:[%s1910_s7 + $0x28] sm:$0x3]  ;;  %v650_v28 = vld [vmem:[#allocation7 + $0x80] sm:$0xff]  ;;  %v535_v31 = vsel %vm512_vm1, %v533_v19, %v534_v22  ;;  %v779_v19 = vrot.slane %v1951_v6, 2  ;;  %s1781_s7 = smov [#allocation9]  }
  0x4b   : > { %1414 = vmatprep.subr.mxu1 %v401_v33  ;;  %1377 = vmatpush3.msra.mxu0 %v300_v32  ;;  %v1981_v30 = vmul.f32 %v1972_v23, %v1972_v23  ;;  %v517_v32 = vsel %vm512_vm1, %v514_v13, %v516_v24  ;;  %v805_v24 = vld [vmem:[#allocation4 + $0x100] sm:$0xff]  ;;  %s1711_s8 = sshll.u32 %s1781_s7, 4  ;;  %s1712_s8 = int_to_ptr.vmem [resolvable:$false] %s1711_s8 }
  0x4c   : > { %1415 = vmatpush3.msra.mxu1 %v401_v33  ;;  %1378 = vmatprep.subr.mxu0 %v299_v34  ;;  %v780_v6 = vsel %vm775_vm0, %v777_v21, %v779_v19  ;;  %v1068_v19 = vld [vmem:[%s2020_s11] sm:$0xff]  ;;  %s1713_s9 = scalar_lea.vmem %s1712_s8, 1024  ;;  %p1714_p11 = scmp.lt.s32.totalorder %s2038_s23, %s1712_s8 }
  0x4d   : > { %1416 = vmatprep.subr.mxu1 %v400_v35  ;;  %1379 = vmatpush3.msra.mxu0 %v299_v34  ;;  %v538_v34 = vrot.slane %v1955_v7, 1  ;;  %p1715_p0 = scmp.lt.s32.totalorder %s1713_s9, %s1707_s6 }
  0x4e   : > { %1417 = vmatpush3.msra.mxu1 %v400_v35  ;;  %1380 = vmatprep.subr.mxu0 %v298_v36  ;;  %v539_v35 = vrot.slane %v1959_v10, 1 }
  0x4f   : > { %1418 = vmatprep.subr.mxu1 %v399_v37  ;;  %1381 = vmatpush3.msra.mxu0 %v298_v36  ;;  %v820_v36 = vld [vmem:[#allocation4 + $0x178] sm:$0xff]  ;;  %p1716_p1 = por %p1715_p0, %p1714_p11 }
  0x50   : > { %1419 = vmatpush3.msra.mxu1 %v399_v37  ;;  %1382 = vmatprep.subr.mxu0 %v297_v38  ;;  %v922_v37 = vld [vmem:[#allocation7 + $0x178] sm:$0xff] }
  0x51   : > { %1420 = vmatprep.subr.mxu1 %v398_v39  ;;  %1383 = vmatpush3.msra.mxu0 %v297_v38  ;;  %v541_v38 = vrot.slane %v1981_v30, 1  ;;  %p1717_p3 = pnand %p1716_p1, %p1710_p8 }
  0x52   : > { %1421 = vmatpush3.msra.mxu1 %v398_v39  ;;  %1384 = vmatprep.subr.mxu0 %v296_v40  ;;  %v819_v39 = vld [vmem:[#allocation4 + $0x170] sm:$0xff] }
  0x53   : > { %1422 = vmatprep.subr.mxu1 %v397_v41  ;;  %1385 = vmatpush3.msra.mxu0 %v296_v40  ;;  %v921_v40 = vld [vmem:[#allocation7 + $0x170] sm:$0xff] }
  0x54   : > { %1423 = vmatpush3.msra.mxu1 %v397_v41  ;;  %1424 = vmatprep.mubr.f32.mxu1 %v1917_v15  ;;  %v515_v15 = vsel %vm512_vm1, %v513_v12, %v514_v13  ;;  %v540_v41 = vsel %vm512_vm1, %v538_v34, %v539_v35  ;;  %v807_v12 = vld [vmem:[#allocation4 + $0x110] sm:$0xff] }
  0x55   : > { %1386 = vmatprep.mubr.f32.mxu0 %v1913_v14  ;;  %1425 = vmatmul.mubr.f32.vlgmr.msra.gmra.mxu1 %v1925_v20  ;;  %v536_v14 = vrot.slane %v1963_v11, 1  ;;  %v909_v13 = vld [vmem:[#allocation7 + $0x110] sm:$0xff] }
  0x56   : > { %1430 = vmatprep.subr.mxu0 %v563_v42  ;;  %1468 = vmatprep.subr.mxu1 %v665_v43 }
  0x57   : > { %1387 = vmatmul.mubr.f32.vlgmr.msra.gmra.mxu0 %v1920_v16  ;;  %1469 = vmatpush3.msra.mxu1 %v665_v43  ;;  %v537_v33 = vsel %vm512_vm1, %v534_v22, %v536_v14  ;;  %v542_v43 = vsel %vm512_vm1, %v539_v35, %v541_v38  ;;  %v793_v22 = vrot.slane %v1963_v11, 2  ;;  %v907_v14 = vld [vmem:[#allocation7 + $0x100] sm:$0xff] }
  0x58   : > { %1431 = vmatpush3.msra.mxu0 %v563_v42  ;;  %1470 = vmatprep.subr.mxu1 %v664_v45  ;;  %v818_v42 = vld [vmem:[#allocation4 + $0x168] sm:$0xff] }
  0x59   : > { %1432 = vmatprep.subr.mxu0 %v562_v44  ;;  %1471 = vmatpush3.msra.mxu1 %v664_v45  ;;  %v817_v45 = vld [vmem:[#allocation4 + $0x160] sm:$0xff] }
  0x5a   : > { %1433 = vmatpush3.msra.mxu0 %v562_v44  ;;  %1472 = vmatprep.subr.mxu1 %v663_v47  ;;  %v920_v44 = vld [vmem:[#allocation7 + $0x168] sm:$0xff] }
  0x5b   : > { %1434 = vmatprep.subr.mxu0 %v561_v46  ;;  %1473 = vmatpush3.msra.mxu1 %v663_v47  ;;  %v816_v47 = vld [vmem:[#allocation4 + $0x158] sm:$0xff] }
  0x5c   : > { %1435 = vmatpush3.msra.mxu0 %v561_v46  ;;  %1474 = vmatprep.subr.mxu1 %v662_v49  ;;  %v919_v46 = vld [vmem:[#allocation7 + $0x160] sm:$0xff] }
  0x5d   : > { %1436 = vmatprep.subr.mxu0 %v560_v48  ;;  %1475 = vmatpush3.msra.mxu1 %v662_v49  ;;  %v815_v49 = vld [vmem:[#allocation4 + $0x150] sm:$0xff] }
  0x5e   : > { %1437 = vmatpush3.msra.mxu0 %v560_v48  ;;  %1476 = vmatprep.subr.mxu1 %v661_v51  ;;  %v918_v48 = vld [vmem:[#allocation7 + $0x158] sm:$0xff] }
  0x5f   : > { %1438 = vmatprep.subr.mxu0 %v559_v50  ;;  %1477 = vmatpush3.msra.mxu1 %v661_v51  ;;  %v814_v51 = vld [vmem:[#allocation4 + $0x148] sm:$0xff] }
  0x60   : > { %1439 = vmatpush3.msra.mxu0 %v559_v50  ;;  %1478 = vmatprep.subr.mxu1 %v660_v53  ;;  %v917_v50 = vld [vmem:[#allocation7 + $0x150] sm:$0xff] }
  0x61   : > { %1440 = vmatprep.subr.mxu0 %v558_v52  ;;  %1479 = vmatpush3.msra.mxu1 %v660_v53  ;;  %v518_v53 = vrot.slane %v1945_v2, 1 }
  0x62   : > { %1441 = vmatpush3.msra.mxu0 %v558_v52  ;;  %1480 = vmatprep.subr.mxu1 %v659_v55  ;;  %v916_v52 = vld [vmem:[#allocation7 + $0x148] sm:$0xff] }
  0x63   : > { %1442 = vmatprep.subr.mxu0 %v557_v54  ;;  %1481 = vmatpush3.msra.mxu1 %v659_v55  ;;  %v521_v55 = vrot.slane %v1972_v23, 1 }
  0x64   : > { %1443 = vmatpush3.msra.mxu0 %v557_v54  ;;  %1482 = vmatprep.subr.mxu1 %v658_v57  ;;  %v519_v54 = vrot.slane %v1948_v5, 1 }
  0x65   : > { %1444 = vmatprep.subr.mxu0 %v556_v56  ;;  %1483 = vmatpush3.msra.mxu1 %v658_v57  ;;  %v915_v57 = vld [vmem:[#allocation7 + $0x140] sm:$0xff] }
  0x66   : > { %1445 = vmatpush3.msra.mxu0 %v556_v56  ;;  %1484 = vmatprep.subr.mxu1 %v657_v59  ;;  %v813_v56 = vld [vmem:[#allocation4 + $0x140] sm:$0xff] }
  0x67   : > { %1446 = vmatprep.subr.mxu0 %v555_v58  ;;  %1485 = vmatpush3.msra.mxu1 %v657_v59  ;;  %v812_v59 = vld [vmem:[#allocation4 + $0x138] sm:$0xff] }
  0x68   : > { %1447 = vmatpush3.msra.mxu0 %v555_v58  ;;  %1486 = vmatprep.subr.mxu1 %v656_v61  ;;  %v520_v58 = vsel %vm512_vm1, %v518_v53, %v519_v54 }
  0x69   : > { %1448 = vmatprep.subr.mxu0 %v554_v60  ;;  %1487 = vmatpush3.msra.mxu1 %v656_v61  ;;  %v522_v61 = vsel %vm512_vm1, %v519_v54, %v521_v55 }
  0x6a   : > { %1449 = vmatpush3.msra.mxu0 %v554_v60  ;;  %1488 = vmatprep.subr.mxu1 %v655_v63  ;;  %v914_v60 = vld [vmem:[#allocation7 + $0x138] sm:$0xff] }
  0x6b   : > { %1450 = vmatprep.subr.mxu0 %v553_v62  ;;  %1489 = vmatpush3.msra.mxu1 %v655_v63  ;;  %v913_v63 = vld [vmem:[#allocation7 + $0x130] sm:$0xff] }
  0x6c   : > { %1451 = vmatpush3.msra.mxu0 %v553_v62  ;;  %1490 = vmatprep.subr.mxu1 %v654_v1  ;;  %v811_v62 = vld [vmem:[#allocation4 + $0x130] sm:$0xff] }
  0x6d   : > { %1452 = vmatprep.subr.mxu0 %v552_v0  ;;  %1491 = vmatpush3.msra.mxu1 %v654_v1  ;;  %v912_v1 = vld [vmem:[#allocation7 + $0x128] sm:$0xff] }
  0x6e   : > { %1453 = vmatpush3.msra.mxu0 %v552_v0  ;;  %1492 = vmatprep.subr.mxu1 %v653_v4  ;;  %v810_v0 = vld [vmem:[#allocation4 + $0x128] sm:$0xff] }
  0x6f   : > { %1454 = vmatprep.subr.mxu0 %v551_v3  ;;  %1493 = vmatpush3.msra.mxu1 %v653_v4  ;;  %v911_v4 = vld [vmem:[#allocation7 + $0x120] sm:$0xff] }
  0x70   : > { %1455 = vmatpush3.msra.mxu0 %v551_v3  ;;  %1427 = vmatprep.mubr.f32.mxu1 %v1955_v7  ;;  %v809_v3 = vld [vmem:[#allocation4 + $0x120] sm:$0xff] }
  0x71   : > { %1456 = vmatprep.subr.mxu0 %v550_v8  ;;  %1494 = vmatprep.subr.mxu1 %v652_v9 }
  0x72   : > { %1389 = vmatprep.mubr.f32.mxu0 %v1945_v2  ;;  %1428 = vmatmul.mubr.f32.gmra.mxu1 %v1959_v10 }
  0x73   : > { %1457 = vmatpush3.msra.mxu0 %v550_v8  ;;  %1495 = vmatpush3.msra.mxu1 %v652_v9  ;;  %v808_v8 = vld [vmem:[#allocation4 + $0x118] sm:$0xff] }
  0x74   : > { %1390 = vmatmul.mubr.f32.gmra.mxu0 %v1948_v5  ;;  %1458 = vmatprep.subr.mxu0 %v549_v17  ;;  %v910_v9 = vld [vmem:[#allocation7 + $0x118] sm:$0xff] }
  0x75   : > { %1496 = vmatprep.subr.mxu1 %v651_v18  ;;  %1459 = vmatpush3.msra.mxu0 %v549_v17  ;;  %v806_v17 = vld [vmem:[#allocation4 + $0x108] sm:$0xff] }
  0x76   : > { %1497 = vmatpush3.msra.mxu1 %v651_v18  ;;  %1460 = vmatprep.subr.mxu0 %v548_v27  ;;  %v908_v18 = vld [vmem:[#allocation7 + $0x108] sm:$0xff] }
  0x77   : > { %1498 = vmatprep.subr.mxu1 %v650_v28  ;;  %1461 = vmatpush3.msra.mxu0 %v548_v27  ;;  %v781_v27 = vrot.slane %v1945_v2, 2  ;;  %v794_v2 = vsel %vm775_vm0, %v791_v26, %v793_v22 }
  0x78   : > { %1462 = vmatprep.mubr.f32.mxu0 %v515_v15  ;;  %1499 = vmatpush3.msra.mxu1 %v650_v28  ;;  %v782_v28 = vrot.slane %v1948_v5, 2  ;;  %v795_v15 = vrot.slane %v1955_v7, 2  ;;  %v784_v5 = vrot.slane %v1972_v23, 2  ;;  %v798_v7 = vrot.slane %v1981_v30, 2 }
  0x79   : > { %1500 = vmatprep.mubr.f32.mxu1 %v535_v31  ;;  %1463 = vmatmul.mubr.f32.vlgmr.msra.gmra.mxu0 %v517_v32  ;;  %v796_v31 = vrot.slane %v1959_v10, 2 }
  0x7a   : > { %1501 = vmatmul.mubr.f32.vlgmr.msra.gmra.mxu1 %v537_v33  ;;  %1506 = vmatprep.subr.mxu0 %v820_v36  ;;  %v783_v10 = vsel %vm775_vm0, %v781_v27, %v782_v28  ;;  %v785_v16 = vsel %vm775_vm0, %v782_v28, %v784_v5  ;;  %v1224_v27 = vld [vmem:[%s2085_s3] ss:$0 sm:$0xff] }
  0x7b   : > { %1544 = vmatprep.subr.mxu1 %v922_v37  ;;  %1507 = vmatpush3.msra.mxu0 %v820_v36  ;;  %v797_v11 = vsel %vm775_vm0, %v795_v15, %v796_v31  ;;  %v799_v20 = vsel %vm775_vm0, %v796_v31, %v798_v7 }
  0x7c   : > { %1545 = vmatpush3.msra.mxu1 %v922_v37  ;;  %1508 = vmatprep.subr.mxu0 %v819_v39 }
  0x7d   : > { %1546 = vmatprep.subr.mxu1 %v921_v40  ;;  %1503 = vmatprep.mubr.f32.mxu1 %v540_v41 }
  0x7e   : > { %1509 = vmatpush3.msra.mxu0 %v819_v39  ;;  %1547 = vmatpush3.msra.mxu1 %v921_v40 }
  0x7f   : > { %1510 = vmatprep.subr.mxu0 %v818_v42  ;;  %1504 = vmatmul.mubr.f32.gmra.mxu1 %v542_v43 }
  0x80   : > { %1548 = vmatprep.subr.mxu1 %v920_v44  ;;  %1511 = vmatpush3.msra.mxu0 %v818_v42 }
  0x81   : > { %1549 = vmatpush3.msra.mxu1 %v920_v44  ;;  %1512 = vmatprep.subr.mxu0 %v817_v45 }
  0x82   : > { %1550 = vmatprep.subr.mxu1 %v919_v46  ;;  %1513 = vmatpush3.msra.mxu0 %v817_v45 }
  0x83   : > { %1551 = vmatpush3.msra.mxu1 %v919_v46  ;;  %1514 = vmatprep.subr.mxu0 %v816_v47 }
  0x84   : > { %1552 = vmatprep.subr.mxu1 %v918_v48  ;;  %1515 = vmatpush3.msra.mxu0 %v816_v47 }
  0x85   : > { %1553 = vmatpush3.msra.mxu1 %v918_v48  ;;  %1516 = vmatprep.subr.mxu0 %v815_v49 }
  0x86   : > { %1554 = vmatprep.subr.mxu1 %v917_v50  ;;  %1517 = vmatpush3.msra.mxu0 %v815_v49 }
  0x87   : > { %1555 = vmatpush3.msra.mxu1 %v917_v50  ;;  %1518 = vmatprep.subr.mxu0 %v814_v51 }
  0x88   : > { %1556 = vmatprep.subr.mxu1 %v916_v52  ;;  %1519 = vmatpush3.msra.mxu0 %v814_v51 }
  0x89   : > { %1557 = vmatpush3.msra.mxu1 %v916_v52  ;;  %1520 = vmatprep.subr.mxu0 %v813_v56 }
  0x8a   : > { %1558 = vmatprep.subr.mxu1 %v915_v57  ;;  %1521 = vmatpush3.msra.mxu0 %v813_v56 }
  0x8b   : > { %1559 = vmatpush3.msra.mxu1 %v915_v57  ;;  %1465 = vmatprep.mubr.f32.mxu0 %v520_v58 }
  0x8c   : > { %1522 = vmatprep.subr.mxu0 %v812_v59  ;;  %1560 = vmatprep.subr.mxu1 %v914_v60 }
  0x8d   : > { %1466 = vmatmul.mubr.f32.gmra.mxu0 %v522_v61  ;;  %1561 = vmatpush3.msra.mxu1 %v914_v60 }
  0x8e   : > { %1523 = vmatpush3.msra.mxu0 %v812_v59  ;;  %1562 = vmatprep.subr.mxu1 %v913_v63 }
  0x8f   : > { %1524 = vmatprep.subr.mxu0 %v811_v62  ;;  %1563 = vmatpush3.msra.mxu1 %v913_v63  ;;  %v1069_v63 = vld [vmem:[%s2020_s11 + $0x8] sm:$0xff] }
  0x90   : > { %1525 = vmatpush3.msra.mxu0 %v811_v62  ;;  %1564 = vmatprep.subr.mxu1 %v912_v1 }
  0x91   : > { %1526 = vmatprep.subr.mxu0 %v810_v0  ;;  %1565 = vmatpush3.msra.mxu1 %v912_v1 }
  0x92   : > { %1527 = vmatpush3.msra.mxu0 %v810_v0  ;;  %1566 = vmatprep.subr.mxu1 %v911_v4 }
  0x93   : > { %1528 = vmatprep.subr.mxu0 %v809_v3  ;;  %1567 = vmatpush3.msra.mxu1 %v911_v4 }
  0x94   : > { %1529 = vmatpush3.msra.mxu0 %v809_v3  ;;  %1568 = vmatprep.subr.mxu1 %v910_v9 }
  0x95   : > { %1530 = vmatprep.subr.mxu0 %v808_v8  ;;  %1569 = vmatpush3.msra.mxu1 %v910_v9 }
  0x96   : > { %1531 = vmatpush3.msra.mxu0 %v808_v8  ;;  %1570 = vmatprep.subr.mxu1 %v909_v13 }
  0x97   : > { %1532 = vmatprep.subr.mxu0 %v807_v12  ;;  %1571 = vmatpush3.msra.mxu1 %v909_v13 }
  0x98   : > { %1533 = vmatpush3.msra.mxu0 %v807_v12  ;;  %1572 = vmatprep.subr.mxu1 %v908_v18 }
  0x99   : > { %1534 = vmatprep.subr.mxu0 %v806_v17  ;;  %1573 = vmatpush3.msra.mxu1 %v908_v18 }
  0x9a   : > { %1535 = vmatpush3.msra.mxu0 %v806_v17  ;;  %1574 = vmatprep.subr.mxu1 %v907_v14 }
  0x9b   : > { %1536 = vmatprep.subr.mxu0 %v805_v24  ;;  %1538 = vmatprep.mubr.f32.mxu0 %v1932_v25 }
  0x9c   : > { %1537 = vmatpush3.msra.mxu0 %v805_v24  ;;  %1575 = vmatpush3.msra.mxu1 %v907_v14 }
  0x9d   : > { %1576 = vmatprep.mubr.f32.mxu1 %v1938_v29  ;;  %1539 = vmatmul.mubr.f32.vlgmr.msra.gmra.mxu0 %v780_v6 }
  0x9e   : > { %1577 = vmatmul.mubr.f32.vlgmr.msra.gmra.mxu1 %v794_v2  ;;  %1541 = vmatprep.mubr.f32.mxu0 %v783_v10 }
  0x9f   : > { %1579 = vmatprep.mubr.f32.mxu1 %v797_v11  ;;  %v1071_v11 = vld [vmem:[%s2020_s11 + $0x18] sm:$0xff] }
  0xa1   : > { %1542 = vmatmul.mubr.f32.gmra.mxu0 %v785_v16 }
  0xa2   : > { %1580 = vmatmul.mubr.f32.gmra.mxu1 %v799_v20 }
 0x115   : > { %v1426_v21 = vpop.f32.mrf.mxu1 }
 0x117   : > { %v479_v26 = vpop.f32.mrf.mxu1  ;;  %v1388_v32 = vpop.f32.mrf.mxu0 }
 0x119   : > { %v378_v34 = vpop.f32.mrf.mxu0 }
 0x132   : > { %v1429_v25 = vpop.f32.mrf.mxu1 }
 0x134   : > { %v489_v23 = vpop.f32.mrf.mxu1  ;;  %v1391_v29 = vpop.f32.mrf.mxu0 }
 0x136   : > { %v388_v37 = vpop.f32.mrf.mxu0 }
 0x139   : > { %v1464_v43 = vpop.f32.mrf.mxu0 }
 0x13a   : > { %v1502_v30 = vpop.f32.mrf.mxu1  ;;  %v756_v1 = vadd.f32 %v1464_v43, %v1388_v32 }
 0x13b   : > { %v768_v38 = vadd.f32 %v1502_v30, %v1426_v21  ;;  %v630_v52 = vpop.f32.mrf.mxu0 }
 0x13c   : > { %v732_v33 = vpop.f32.mrf.mxu1  ;;  %v755_v4 = vadd.f32 %v630_v52, %v378_v34 }
 0x13d   : > { %v767_v40 = vadd.f32 %v732_v33, %v479_v26 }
 0x13f   : > { %v1505_v35 = vpop.f32.mrf.mxu1 }
 0x140   : > { %v770_v46 = vadd.f32 %v1505_v35, %v1429_v25 }
 0x141   : > { %v742_v36 = vpop.f32.mrf.mxu1 }
 0x142   : > { %v769_v48 = vadd.f32 %v742_v36, %v489_v23  ;;  %v1070_v23 = vld [vmem:[%s2020_s11 + $0x10] sm:$0xff] }
 0x14d   : > { %v1467_v54 = vpop.f32.mrf.mxu0 }
 0x14e   : > { %v758_v8 = vadd.f32 %v1467_v54, %v1391_v29 }
 0x14f   : > { %v640_v57 = vpop.f32.mrf.mxu0 }
 0x150   : > { %v757_v14 = vadd.f32 %v640_v57, %v388_v37 }
 0x15d   : > { %v1540_v58 = vpop.f32.mrf.mxu0 }
 0x15e   : > { %v1578_v39 = vpop.f32.mrf.mxu1  ;;  %v1013_v13 = vadd.f32 %v1540_v58, %v756_v1 }
 0x15f   : > { %v1025_v41 = vadd.f32 %v1578_v39, %v768_v38  ;;  %v887_v61 = vpop.f32.mrf.mxu0 }
 0x160   : > { %v989_v42 = vpop.f32.mrf.mxu1  ;;  %v1012_v28 = vadd.f32 %v887_v61, %v755_v4 }
 0x161   : > { %v1037_v44 = vmax.f32 %v1025_v41, 1e-08  ;;  %v1024_v45 = vadd.f32 %v989_v42, %v767_v40  ;;  %v1543_v22 = vpop.f32.mrf.mxu0 }
 0x162   : > { %v1581_v47 = vpop.f32.mrf.mxu1  ;;  %v1015_v34 = vadd.f32 %v1543_v22, %v758_v8 }
 0x163   : > { %1647 = vrsqrt.f32 %v1037_v44  ;;  %v1036_v49 = vmax.f32 %v1024_v45, 1e-08  ;;  %v1027_v50 = vadd.f32 %v1581_v47, %v770_v46  ;;  %vm1049_vm2 = vcmp.eq.f32.partialorder %v1037_v44, inf  ;;  %v897_v26 = vpop.f32.mrf.mxu0 }
 0x164   : > { %v999_v51 = vpop.f32.mrf.mxu1  ;;  %v1052_v62 = vand.u32 2147483648, %v1037_v44  ;;  %vm1051_vm3 = vcmp.eq.f32.partialorder %v1037_v44, 0.0  ;;  %v1014_v37 = vadd.f32 %v897_v26, %v757_v14 }
 0x165   : > { %v1026_v53 = vadd.f32 %v999_v51, %v769_v48  ;;  %1649 = vrsqrt.f32 %v1036_v49  ;;  %v1039_v55 = vmax.f32 %v1027_v50, 1e-08  ;;  %vm1042_vm4 = vcmp.eq.f32.partialorder %v1036_v49, inf }
 0x166   : > { %v1045_v18 = vand.u32 2147483648, %v1036_v49  ;;  %vm1044_vm5 = vcmp.eq.f32.partialorder %v1036_v49, 0.0 }
 0x167   : > { %v1038_v56 = vmax.f32 %v1026_v53, 1e-08  ;;  %1651 = vrsqrt.f32 %v1039_v55  ;;  %vm1063_vm6 = vcmp.eq.f32.partialorder %v1039_v55, inf  ;;  %vm1065_vm7 = vcmp.eq.f32.partialorder %v1039_v55, 0.0 }
 0x168   : > { %v1066_v10 = vand.u32 2147483648, %v1039_v55 }
 0x169   : > { %1653 = vrsqrt.f32 %v1038_v56  ;;  %vm1056_vm8 = vcmp.eq.f32.partialorder %v1038_v56, inf  ;;  %v1059_v25 = vand.u32 2147483648, %v1038_v56  ;;  %vm1058_vm9 = vcmp.eq.f32.partialorder %v1038_v56, 0.0 }
 0x170   : > { %v1648_v59 = vpop.eup %1647 }
 0x171   : > { %v1048_v60 = vmul.f32 %v1648_v59, %v1037_v44 }
 0x172   : > { %v1650_v0 = vpop.eup %1649 }
 0x173   : > { %v1050_v3 = vsel %vm1049_vm2, %v1037_v44, %v1048_v60  ;;  %v1041_v12 = vmul.f32 %v1650_v0, %v1036_v49 }
 0x174   : > { %v1053_v9 = vsel %vm1051_vm3, %v1052_v62, %v1050_v3  ;;  %v1652_v24 = vpop.eup %1651 }
 0x175   : > { %v1073_v17 = vmul.f32 %v1069_v63, %v1053_v9  ;;  %v1043_v15 = vsel %vm1042_vm4, %v1036_v49, %v1041_v12  ;;  %v1062_v5 = vmul.f32 %v1652_v24, %v1039_v55 }
 0x176   : > { %v1654_v31 = vpop.eup %1653  ;;  %v1046_v2 = vsel %vm1044_vm5, %v1045_v18, %v1043_v15 }
 0x177   : > { %v1081_v6 = vadd.f32 %v1073_v17, %v1013_v13  ;;  %v1072_v7 = vmul.f32 %v1068_v19, %v1046_v2  ;;  %v1055_v16 = vmul.f32 %v1654_v31, %v1038_v56  ;;  %v1064_v21 = vsel %vm1063_vm6, %v1039_v55, %v1062_v5 }
 0x178   : > { %v1067_v32 = vsel %vm1065_vm7, %v1066_v10, %v1064_v21 }
 0x179   : > { %v1092_v20 = vadd.f32 %v1224_v27, %v1081_v6  ;;  %v1080_v30 = vadd.f32 %v1072_v7, %v1012_v28  ;;  %v1057_v33 = vsel %vm1056_vm8, %v1038_v56, %v1055_v16  ;;  %v1075_v35 = vmul.f32 %v1071_v11, %v1067_v32 }
 0x17a   : > { %v1060_v29 = vsel %vm1058_vm9, %v1059_v25, %v1057_v33 }
 0x17b   : > { %1096 = vst [vmem:[%s268_s16 + $0x8] sm:$0xff] %v1092_v20  ;;  %v1091_v36 = vadd.f32 %v1224_v27, %v1080_v30  ;;  %v1074_v38 = vmul.f32 %v1070_v23, %v1060_v29  ;;  %v1083_v39 = vadd.f32 %v1075_v35, %v1015_v34 }
 0x17d   : > { %v1082_v40 = vadd.f32 %v1074_v38, %v1014_v37  ;;  %1095 = vst [vmem:[%s268_s16] sm:$0xff] %v1091_v36  ;;  %v1094_v41 = vadd.f32 %v1224_v27, %v1083_v39 }
 0x17f   : > { %v1093_v42 = vadd.f32 %v1224_v27, %v1082_v40  ;;  %1098 = vst [vmem:[%s268_s16 + $0x18] sm:$0xff] %v1094_v41 }
 0x181   : > { %1097 = vst [vmem:[%s268_s16 + $0x10] sm:$0xff] %v1093_v42 }
 0x182   : > { %1720 = shalt.err (!%p1717_p3)
}
 0x183   : > { %s1721_s10 = scalar_lea.hbm %s2036_s30, 512  ;;  %s1725_s13 = scalar_lea.hbm %s2087_s5, 1024 }
 0x184   : > { %p1722_p2 = scmp.ne.s32.totalorder %s2036_s30, %s1721_s10  ;;  %p1726_p7 = scmp.lt.s32.totalorder %s2036_s30, %s2087_s5 }
 0x185   : > { %p1727_p6 = scmp.lt.s32.totalorder %s1725_s13, %s1721_s10 }
 0x186   : > { %p1723_p4 = pnand %p1722_p2, %p1852_p5 }
 0x187   : > { %p1728_p9 = por %p1727_p6, %p1726_p7 }
 0x188   : > { %p1724_p13 = pneg %p1723_p4 }
 0x18a   : > { %p1729_p10 = pnand %p1728_p9, %p1724_p13 }
 0x18c   : > { %1732 = shalt.err (!%p1729_p10)
}
 0x18d   : > { %s1782_s16 = smov 128   ;;  %s1783_s17 = smov 8  }
 0x18e   : > { %1591 = dma.vmem_to_hbm [thread:$0]  (%p1852_p5), %s2038_s23, 512, %s2036_s30, %s2042_s22, %s1782_s16, %s1782_s16, %s1783_s17  }
 0x18f PF: > { %p1608_p12 = scmp.ge.s32.totalorder %s1775_s21, 2  ;;  %s1129_s25 = sand.u32 1, %s1763_s18  }
 0x190   : > { %p2097_p8 = scmp.ne.s32.totalorder %s2090_s29, 0  ;;  %s1130_s26 = scalar_lea.sflag [#allocation6], %s1129_s25 }
 0x192   : > { %p1601_p11 = pnand %p1608_p12, %p2097_p8 }
 0x194   : > { %p1602_p0 = pneg %p1601_p11 }
 0x196   : > { %1758 = dma.done.wait (%p1602_p0), %s1130_s26, 512  }
 0x197   : > { %1760 = vsyncadd (%p1602_p0), %s1130_s26, 4294966784  ;;  %p17_p1 = scmp.ge.s32.totalorder %s1839_s24, 4   ;;  %s2098_s18 = smov %s1767_s19 }
 0x198   : > { %s2099_s19 = smov %s1771_s20  ;;  %s2100_s20 = smov %s1850_s27 }
 0x199   : > { %s2101_s21 = smov %s1839_s24  ;;  %19 = sbr.rel (!%p17_p1) target bundleno = 5 (0x5), region = 91 }
 0x19e   :  { %1135 = vsyncpa [#allocation5], 1 }
 0x19f   :  { %1137 = vsyncpa [#allocation5 + $0x1], 1 }
 0x1a0   :  { %1138 = vsyncpa [#allocation8], 1 }
 0x1a1   :  { %1139 = vsyncpa [#allocation6], 1 }
 0x1a2   :  { %1141 = vsyncpa [#allocation6 + $0x1], 1 }

</bundles_post_ra>
